<compile_context>
chip_gen: v7x
topology: tpu7x:2x2x1
jax: 0.10.0
libtpu: 0.0.40
codegen_flags: <defaults>
</compile_context>

<pallas_src>
import jax
import jax.numpy as jnp
from jax.experimental import pallas as pl
from jax.experimental.pallas import tpu as pltpu


# ----------------------------- kernels -------------------------------------


def _add_mask(x_f32, m_ref):
    """Apply the mask in f32. Float mask = additive (module semantics);
    bool/int mask = validity mask (nonzero keeps, zero -> -inf bias)."""
    if jnp.issubdtype(m_ref.dtype, jnp.floating):
        return x_f32 + m_ref[...].astype(jnp.float32)
    keep = m_ref[...].astype(jnp.int32) != 0
    return jnp.where(keep, x_f32, jnp.float32(-jnp.inf))


def _softmax_kernel(w_ref, o_ref):
    x = w_ref[...].astype(jnp.float32)
    x_max = jnp.max(x, axis=-1, keepdims=True)
    e = jnp.exp(x - x_max)
    o_ref[...] = (e / jnp.sum(e, axis=-1, keepdims=True)).astype(o_ref.dtype)


def _softmax_masked_kernel(w_ref, m_ref, o_ref):
    x = _add_mask(w_ref[...].astype(jnp.float32), m_ref)
    x_max = jnp.max(x, axis=-1, keepdims=True)
    e = jnp.exp(x - x_max)
    # Fully -inf rows yield NaN rows, matching torch.nn.Softmax semantics.
    o_ref[...] = (e / jnp.sum(e, axis=-1, keepdims=True)).astype(o_ref.dtype)


def _sigmoid_kernel(w_ref, o_ref):
    o_ref[...] = jax.nn.sigmoid(w_ref[...].astype(jnp.float32)).astype(o_ref.dtype)


def _sigmoid_masked_kernel(w_ref, m_ref, o_ref):
    x = _add_mask(w_ref[...].astype(jnp.float32), m_ref)
    o_ref[...] = jax.nn.sigmoid(x).astype(o_ref.dtype)


# ----------------------------- tiling helpers -------------------------------

_TILE_TARGET_BYTES = 2 * 1024 * 1024   # ~2 MiB weight tile: HBM-roofline sweet
                                        # spot on v5e/v6e/v7x.


def _sublane_pack(dtype):
    """Rows per vreg sublane group for a dtype: f32->8, bf16->16, int8->32."""
    itemsize = jnp.dtype(dtype).itemsize
    return max(8, (4 // max(itemsize, 1)) * 8)


def _pick_row_tile(n_rows, s2, dtypes):
    """Rows per tile: ~2 MiB of the weight dtype, rounded to the coarsest
    sublane pack among all I/O dtypes (or the full dim if it fits)."""
    pack = max(_sublane_pack(d) for d in dtypes)
    bytes_per_row = max(s2, 1) * jnp.dtype(dtypes[0]).itemsize
    budget_rows = max(pack, _TILE_TARGET_BYTES // bytes_per_row)
    if n_rows <= budget_rows:
        return n_rows                   # full second-to-last dim: always legal
    tm = max(pack, (budget_rows // pack) * pack)
    for cand in range(tm, pack - 1, -pack):   # prefer a divisor (no ragged tail)
        if n_rows % cand == 0:
            return cand
    return tm                           # ragged last block; Pallas masks writes


def _vmem_limit_bytes(tm, s2, dtypes):
    """Explicit scoped-VMEM sizing: streams x double buffers + f32 temps."""
    w_tile = tm * s2 * jnp.dtype(dtypes[0]).itemsize          # weights / output
    m_tile = sum(tm * s2 * jnp.dtype(d).itemsize for d in dtypes[1:])
    dma = 2 * (2 * w_tile + m_tile)     # double-buffered in + out (+ mask)
    temps = 3 * tm * s2 * 4             # f32 intermediates in the body
    need = int((dma + temps) * 1.25) + (1 << 20)
    # Clamp: >=16 MiB (cheap everywhere), <=40 MiB (safe within v7x's 64 MiB
    # physical per TC; v5e/v6e have 128 MiB physical).
    return int(min(max(need, 16 << 20), 40 << 20))


# ----------------------------- wrapper --------------------------------------


def attention_weight_normalizer(attention_weights, attn_mask, *, gating,
                                row_tile=None):
    """attention_weights: [B, H, S1, S2].
    attn_mask: None, [B, 1, S1, S2] or [B, H, S1, S2]; float masks are
    additive (0 / -inf), bool/int masks are validity masks (nonzero = keep).
    Returns same shape/dtype as attention_weights."""
    B, H, S1, S2 = attention_weights.shape
    w_dtype = attention_weights.dtype

    # ---------------- flattened row grid: no mask, or per-head mask ---------
    if attn_mask is None or attn_mask.shape[1] == H:
        rows = B * H * S1
        w2 = attention_weights.reshape(rows, S2)   # contiguous collapse: free
        operands = [w2]
        dtypes = [w_dtype]
        if attn_mask is not None:
            assert attn_mask.shape == attention_weights.shape, "bad mask shape"
            operands.append(attn_mask.reshape(rows, S2))
            dtypes.append(attn_mask.dtype)
            kernel = _sigmoid_masked_kernel if gating else _softmax_masked_kernel
        else:
            kernel = _sigmoid_kernel if gating else _softmax_kernel

        tm = row_tile if row_tile is not None else _pick_row_tile(rows, S2, dtypes)
        blk = (tm, S2)                              # S2 kept lane-dense
        spec = pl.BlockSpec(blk, lambda r: (r, 0))
        out = pl.pallas_call(
            kernel,
            out_shape=jax.ShapeDtypeStruct((rows, S2), w_dtype),
            grid=(pl.cdiv(rows, tm),),
            in_specs=[spec] * len(operands),
            out_specs=spec,
            compiler_params=pltpu.CompilerParams(
                dimension_semantics=("parallel",),
                vmem_limit_bytes=_vmem_limit_bytes(tm, S2, dtypes)),
        )(*operands)
        return out.reshape(B, H, S1, S2)

    # ---------------- broadcast mask [B, 1, S1, S2]: head-reuse grid --------
    mB, mH, mS1, mS2 = attn_mask.shape
    assert (mB, mH, mS1, mS2) == (B, 1, S1, S2), "bad mask shape"
    dtypes = [w_dtype, attn_mask.dtype]
    tm = row_tile if row_tile is not None else _pick_row_tile(S1, S2, dtypes)
    blk = (1, 1, tm, S2)

    # Head axis innermost; mask block index is invariant in h, so the mask
    # tile is DMA'd once per (b, row-tile) and reused for all H heads.
    w_spec = pl.BlockSpec(blk, lambda b, r, h: (b, h, r, 0))
    m_spec = pl.BlockSpec(blk, lambda b, r, h: (b, 0, r, 0))
    o_spec = pl.BlockSpec(blk, lambda b, r, h: (b, h, r, 0))
    kernel = _sigmoid_masked_kernel if gating else _softmax_masked_kernel

    return pl.pallas_call(
        kernel,
        out_shape=jax.ShapeDtypeStruct(attention_weights.shape, w_dtype),
        grid=(B, pl.cdiv(S1, tm), H),
        in_specs=[w_spec, m_spec],
        out_specs=o_spec,
        compiler_params=pltpu.CompilerParams(
            # h stays "arbitrary" so megacore sharding does not split the
            # mask-reuse window; B and the row axis shard across TCs.
            dimension_semantics=("parallel", "parallel", "arbitrary"),
            vmem_limit_bytes=_vmem_limit_bytes(tm, S2, dtypes)),
    )(attention_weights, attn_mask)


# ----------------------------- self-test -------------------------------------


if __name__ == "__main__":
    key = jax.random.PRNGKey(0)
    B, H, S = 2, 4, 16
    k1, _ = jax.random.split(key)

    attention_weights = jax.random.normal(k1, (B, H, S, S), dtype=jnp.float32)

    # {0, -inf} mask: mask out keys beyond a per-batch length; every row keeps
    # at least one valid key so no softmax row is fully masked.
    lengths = jnp.array([S, S // 2], dtype=jnp.int32)
    key_idx = jnp.arange(S)[None, None, None, :]                 # [1,1,1,S]
    valid = key_idx < lengths[:, None, None, None]               # [B,1,1,S]
    valid = jnp.broadcast_to(valid, (B, 1, S, S))                # [B,1,S,S]
    attn_mask = jnp.where(valid, 0.0, -jnp.inf).astype(jnp.float32)

    # Broadcast-mask (mH=1) paths: softmax + sigmoid (head-reuse grid).
    out_softmax = attention_weight_normalizer(attention_weights, attn_mask,
                                              gating=False)
    out_sigmoid = attention_weight_normalizer(attention_weights, attn_mask,
                                              gating=True)
    jax.block_until_ready(out_softmax)
    jax.block_until_ready(out_sigmoid)

    # Per-head mask (mH=H) path: flattened row grid.
    mask_full = jnp.broadcast_to(attn_mask, (B, H, S, S))
    out_softmax_full = attention_weight_normalizer(attention_weights, mask_full,
                                                   gating=False)
    jax.block_until_ready(out_softmax_full)

    # attn_mask=None paths (mask-free kernels, flattened row grid).
    out_softmax_nm = attention_weight_normalizer(attention_weights, None,
                                                 gating=False)
    out_sigmoid_nm = attention_weight_normalizer(attention_weights, None,
                                                 gating=True)
    jax.block_until_ready(out_softmax_nm)
    jax.block_until_ready(out_sigmoid_nm)

    # Compact int8 validity-mask path (4x less mask traffic at the source).
    out_softmax_i8 = attention_weight_normalizer(attention_weights,
                                                 valid.astype(jnp.int8),
                                                 gating=False)
    jax.block_until_ready(out_softmax_i8)

    # Plain-JAX references.
    mask_b = jnp.broadcast_to(attn_mask, attention_weights.shape)
    ref_soft = jax.nn.softmax(attention_weights + mask_b, axis=-1)
    ref_sig = jax.nn.sigmoid(attention_weights + mask_b)
    ref_soft_nm = jax.nn.softmax(attention_weights, axis=-1)
    ref_sig_nm = jax.nn.sigmoid(attention_weights)

    # Exact divide in the kernel -> tight tolerances.
    assert jnp.allclose(out_softmax, ref_soft, atol=1e-5, rtol=1e-5)
    assert jnp.allclose(out_softmax_full, ref_soft, atol=1e-5, rtol=1e-5)
    assert jnp.allclose(out_softmax_i8, ref_soft, atol=1e-5, rtol=1e-5)
    assert jnp.allclose(out_softmax_nm, ref_soft_nm, atol=1e-5, rtol=1e-5)
    assert jnp.allclose(out_sigmoid, ref_sig, atol=1e-5, rtol=1e-5)
    assert jnp.allclose(out_sigmoid_nm, ref_sig_nm, atol=1e-5, rtol=1e-5)

    # TODO(synk): fully -inf rows produce NaN rows (0/0), matching
    # torch.nn.Softmax; the PyTorch module's fix_nans helper is unused in
    # forward and not reproduced. Runtime asserts on mask min/max are input
    # validation only and not reproduced.

    print("KERNEL_OK")
</pallas_src>

<mosaic_0001>
module attributes {stable_mosaic.version = 11 : i64} {
  func.func @_softmax_masked_kernel(%arg0: i32, %arg1: i32, %arg2: i32, %arg3: memref<1x1x16x16xf32, #tpu.memory_space<vmem>>, %arg4: memref<1x1x16x16xf32, #tpu.memory_space<vmem>>, %arg5: memref<1x1x16x16xf32, #tpu.memory_space<vmem>>) attributes {dimension_semantics = [#tpu.dimension_semantics<parallel>, #tpu.dimension_semantics<parallel>, #tpu.dimension_semantics<arbitrary>], iteration_bounds = array<i64: 2, 1, 4>, scalar_prefetch = 0 : i64, scratch_operands = 0 : i64, tpu.core_type = #tpu.core_type<tc>, window_params = [{transform_indices = @transform_0, window_bounds = array<i64: 1, 1, 16, 16>}, {transform_indices = @transform_1, window_bounds = array<i64: 1, 1, 16, 16>}, {transform_indices = @transform_2, window_bounds = array<i64: 1, 1, 16, 16>}]} {
    %c0 = arith.constant 0 : index
    %c0_0 = arith.constant 0 : index
    %c0_1 = arith.constant 0 : index
    %c0_2 = arith.constant 0 : index
    %0 = vector.load %arg3[%c0, %c0_0, %c0_1, %c0_2] : memref<1x1x16x16xf32, #tpu.memory_space<vmem>>, vector<1x1x16x16xf32>
    %c0_3 = arith.constant 0 : index
    %c0_4 = arith.constant 0 : index
    %c0_5 = arith.constant 0 : index
    %c0_6 = arith.constant 0 : index
    %1 = vector.load %arg4[%c0_3, %c0_4, %c0_5, %c0_6] : memref<1x1x16x16xf32, #tpu.memory_space<vmem>>, vector<1x1x16x16xf32>
    %2 = arith.addf %0, %1 : vector<1x1x16x16xf32>
    %cst = arith.constant dense<0xFF800000> : vector<1x1x16xf32>
    %3 = vector.multi_reduction <maximumf>, %2, %cst [3] : vector<1x1x16x16xf32> to vector<1x1x16xf32>
    %4 = vector.shape_cast %3 : vector<1x1x16xf32> to vector<1x1x16x1xf32>
    %5 = vector.broadcast %4 : vector<1x1x16x1xf32> to vector<1x1x16x16xf32>
    %6 = arith.subf %2, %5 : vector<1x1x16x16xf32>
    %7 = math.exp %6 : vector<1x1x16x16xf32>
    %cst_7 = arith.constant dense<0.000000e+00> : vector<1x1x16xf32>
    %8 = vector.multi_reduction <add>, %7, %cst_7 [3] : vector<1x1x16x16xf32> to vector<1x1x16xf32>
    %9 = vector.shape_cast %8 : vector<1x1x16xf32> to vector<1x1x16x1xf32>
    %10 = vector.broadcast %9 : vector<1x1x16x1xf32> to vector<1x1x16x16xf32>
    %11 = arith.divf %7, %10 : vector<1x1x16x16xf32>
    %c0_8 = arith.constant 0 : index
    %c0_9 = arith.constant 0 : index
    %c0_10 = arith.constant 0 : index
    %c0_11 = arith.constant 0 : index
    %12 = vector.load %arg5[%c0_8, %c0_9, %c0_10, %c0_11] : memref<1x1x16x16xf32, #tpu.memory_space<vmem>>, vector<1x1x16x16xf32>
    tpu.vector_store %arg5[%c0_8, %c0_9, %c0_10, %c0_11], %11 {strides = array<i32>} : memref<1x1x16x16xf32, #tpu.memory_space<vmem>>, vector<1x1x16x16xf32>,
    return
  }
  func.func @transform_0(%arg0: i32, %arg1: i32, %arg2: i32) -> (i32, i32, i32, i32) {
    %c0_i32 = arith.constant 0 : i32
    %c0_i32_0 = arith.constant 0 : i32
    return %arg0, %arg2, %arg1, %c0_i32 : i32, i32, i32, i32
  }
  func.func @transform_1(%arg0: i32, %arg1: i32, %arg2: i32) -> (i32, i32, i32, i32) {
    %c0_i32 = arith.constant 0 : i32
    %c0_i32_0 = arith.constant 0 : i32
    %c0_i32_1 = arith.constant 0 : i32
    return %arg0, %c0_i32, %arg1, %c0_i32_0 : i32, i32, i32, i32
  }
  func.func @transform_2(%arg0: i32, %arg1: i32, %arg2: i32) -> (i32, i32, i32, i32) {
    %c0_i32 = arith.constant 0 : i32
    %c0_i32_0 = arith.constant 0 : i32
    return %arg0, %arg2, %arg1, %c0_i32 : i32, i32, i32, i32
  }
}

</mosaic_0001>

<bundles_post_ra>
// kernel: tpu_custom_call.1
= control target key start
LH: loop header
LB: loop body
LE: loop exit
PB: predicated region body
PF: predicated region fallthrough
CT: control target
= control target key end

     0   :  { %s1086_s0 = inlined_call_operand.hbm [shape: f32[2,4,16,16], index: 0, kind: input, shape index: {}]   ;;  %s1087_s1 = inlined_call_operand.hbm [shape: f32[2,1,16,16], index: 1, kind: input, shape index: {}]   ;;  %s1088_s2 = inlined_call_operand.hbm [shape: f32[2,4,16,16], index: 2, kind: output, shape index: {}]  }
   0x1   :  { %1100 = sst [smem:[#allocation14_spill]] %s1088_s2 }
   0x2   :  { %7 = vsyncpa [#allocation3], 0 }
   0x3   :  { %9 = vsyncpa [#allocation3 + $0x1], 0 }
   0x4   :  { %10 = vsyncpa [#allocation6], 0 }
   0x5   :  { %12 = vsyncpa [#allocation6 + $0x1], 0 }
   0x6   :  { %13 = vsyncpa [#allocation4], 0 }
   0x7   :  { %15 = vsyncpa [#allocation4 + $0x1], 0  ;;  %s763_s9 = smov 0   ;;  %s765_s10 = smov 0  }
   0x8   :  { %s767_s11 = smov 0   ;;  %s769_s12 = smov 0  }
   0x9   :  { %s771_s13 = smov 0   ;;  %s773_s14 = smov 0  }
   0xa   :  { %s775_s15 = smov 0   ;;  %s777_s16 = smov 0  }
   0xb   :  { %s779_s17 = smov 0   ;;  %s781_s18 = smov 0  }
   0xc   :  { %s783_s19 = smov 0  }
   0xd LB: > { %1101 = sst [smem:[#allocation11_spill]] %s711_s12  ;;  %s412_s20 = sadd.s32 4294967295, %s739_s19   ;;  %s739_s19 = sphi %s783_s19, %s21_s19   ;;  %s735_s18 = sphi %s781_s18, %s1136_s18   ;;  %s731_s17 = sphi %s779_s17, %s1135_s17   ;;  %s727_s16 = sphi %s777_s16, %s1134_s16   ;;  %s723_s15 = sphi %s775_s15, %s1133_s15   ;;  %s719_s14 = sphi %s773_s14, %s1132_s14   ;;  %s715_s13 = sphi %s771_s13, %s1131_s13   ;;  %s711_s12 = sphi %s769_s12, %s1130_s12   ;;  %s707_s11 = sphi %s767_s11, %s1129_s11   ;;  %s703_s10 = sphi %s765_s10, %s1128_s10   ;;  %s699_s9 = sphi %s763_s9, %s1127_s9  }
   0xe   : > { %s413_s21 = sadd.s32 4294967294, %s739_s19   ;;  %s33_s22 = sadd.s32 1, %s731_s17 }
   0xf   : > { %s40_s23 = sadd.s32 1, %s735_s18  ;;  %p34_p0 = scmp.ge.s32.totalorder %s33_s22, 4 }
  0x10   : > { %s51_s24 = sadd.s32 1, %s719_s14  ;;  %p58_p1 = scmp.ne.s32.totalorder %s719_s14, %s715_s13 }
  0x11   : > { %p1094_p2 = scmp.eq.s32.totalorder %s739_s19, 0  ;;  %s1138_s22 = smov (%p34_p0, %s33_s22), 0 }
  0x12   : > { %1102 = sst [smem:[#allocation12_spill]] %s1138_s22  ;;  %s1140_s23 = smov (!%p34_p0, %s40_s23), %s735_s18 }
  0x13   : > { %s45_s25 = ssub.s32 %s731_s17, %s1138_s22  ;;  %p833_p3 = por %p1094_p2, %p58_p1 }
  0x14   : > { %p42_p4 = scmp.ge.s32.totalorder %s1140_s23, 2  ;;  %p64_p5 = scmp.ne.s32.totalorder %s715_s13, %s711_s12 }
  0x15   : > { %p839_p6 = scmp.eq.s32.totalorder %s412_s20, 0  ;;  %p120_p7 = scmp.eq.s32.totalorder %s412_s20, 7 }
  0x16   : > { %s1142_s23 = smov (%p42_p4, %s1140_s23), 0  ;;  %p126_p10 = scmp.eq.s32.totalorder %s413_s21, 7 }
  0x17   : > { %1105 = sst [smem:[#allocation13_spill]] %s1142_s23  ;;  %p847_p8 = por %p839_p6, %p64_p5 }
  0x18   : > { %p851_p9 = por %p120_p7, %p58_p1  ;;  %s857_s30 = ssub.s32 %s735_s18, %s1142_s23 }
  0x19   : > { %s1106_s28 = scalar_select %p847_p8, 1, 0 }
  0x1a   : > { %s1107_s29 = scalar_select %p851_p9, 1, 0 }
  0x1b   : > { %s46_s3 = sor.u32 %s45_s25, %s857_s30  ;;  %p861_p13 = por %p126_p10, %p64_p5 }
  0x1c   : > { %p49_p12 = scmp.eq.s32.totalorder %s46_s3, 0  ;;  %p1093_p0 = scmp.lt.s32.totalorder %s739_s19, 8 }
  0x1d   : > { %s1108_s4 = scalar_select %p861_p13, 1, 0 }
  0x1e   : > { %s867_s5 = scalar_select %p49_p12, %s719_s14, %s51_s24  }
  0x1f   : > { %s146_s6 = sand.u32 1, %s719_s14   ;;  %s417_s7 = sshll.u32 %s731_s17, 1 }
  0x20   : > { %s416_s8 = sshll.u32 %s146_s6, 4  ;;  %s418_s20 = sshll.u32 %s735_s18, 3 }
  0x21   : > { %s158_s23 = sadd.s32 %s418_s20, %s417_s7  ;;  %s150_s22 = scalar_lea.vmem [#allocation2], %s416_s8 }
  0x22   : > { %s161_s21 = sshll.u32 %s150_s22, 4  ;;  %s419_s25 = sshll.u32 %s158_s23, 7  ;;  %s872_s21 = int_to_ptr.vmem [resolvable:$true] %s161_s21 }
  0x23   : > { %s877_s3 = scalar_lea.hbm %s1086_s0, %s419_s25  ;;  %p883_p1 = pnand %p1093_p0, %p833_p3 }
  0x24   : > { %s888_s22 = scalar_lea.sflag [#allocation3], %s146_s6  ;;  %s553_s23 = scalar_lea.hbm %s877_s3, 256 }
  0x25   : > { %p554_p5 = scmp.ne.s32.totalorder %s877_s3, %s553_s23  ;;  %p555_p7 = pneg %p883_p1 }
  0x26   : > { %s558_s26 = scalar_lea.hbm %s1086_s0, 2048  ;;  %p559_p3 = scmp.lt.u32.totalorder %s877_s3, %s1086_s0 }
  0x27   : > { %p556_p10 = pnand %p555_p7, %p554_p5  ;;  %p560_p0 = scmp.lt.u32.totalorder %s558_s26, %s553_s23 }
  0x28   : > { %p562_p11 = scmp.lt.u32.totalorder %s553_s23, %s877_s3 }
  0x29   : > { %p557_p12 = pneg %p556_p10  ;;  %p561_p2 = por %p560_p0, %p559_p3 }
  0x2b   : > { %p563_p4 = por %p562_p11, %p561_p2 }
  0x2d   : > { %p564_p13 = pnand %p563_p4, %p557_p12 }
  0x2f   : > { %567 = shalt.err (!%p564_p13)
}
  0x30   : > { %s568_s6 = scalar_lea.vmem %s872_s21, 256  ;;  %s741_s20 = smov [#allocation2]  }
  0x31   : > { %p569_p5 = scmp.ne.s32.totalorder %s872_s21, %s568_s6  ;;  %s573_s25 = sshll.u32 %s741_s20, 4  ;;  %s574_s25 = int_to_ptr.vmem [resolvable:$false] %s573_s25 }
  0x32   : > { %s575_s2 = scalar_lea.vmem %s574_s25, 512  ;;  %p576_p8 = scmp.lt.s32.totalorder %s872_s21, %s574_s25 }
  0x33   : > { %p571_p10 = pnand %p569_p5, %p555_p7  ;;  %p577_p0 = scmp.lt.s32.totalorder %s575_s2, %s568_s6 }
  0x35   : > { %p572_p9 = pneg %p571_p10  ;;  %p578_p3 = por %p577_p0, %p576_p8 }
  0x37   : > { %p579_p2 = pnand %p578_p3, %p572_p9 }
  0x39   : > { %582 = shalt.err (!%p579_p2)
}
  0x3a   : > { %s1097_s23 = smov 128   ;;  %s1098_s12 = smov 8  }
  0x3b   : > { %443 = dma.hbm_to_vmem [thread:$0]  (!%p883_p1), %s877_s3, 256, %s872_s21, %s888_s22, %s1097_s23, %s1097_s23, %s1098_s12  }
  0x3c   : > { %p192_p8 = scmp.lt.s32.totalorder %s739_s19, 9  ;;  %p1110_p9 = scmp.ge.s32.totalorder %s739_s19, 1 }
  0x3d   : > { %s79_s7 = sadd.s32 1, %s707_s11  ;;  %p86_p13 = scmp.ne.s32.totalorder %s707_s11, %s703_s10 }
  0x3e   : > { %p922_p11 = pnand %p1110_p9, %p192_p8  ;;  %p1112_p4 = scmp.eq.s32.totalorder %s857_s30, 0 }
  0x3f   : > { %p1113_p7 = scmp.eq.s32.totalorder %s739_s19, 0  ;;  %p92_p5 = scmp.ne.s32.totalorder %s703_s10, %s699_s9 }
  0x40   : > { %s932_s8 = scalar_select %p1112_p4, %s707_s11, %s79_s7  }
  0x41   : > { %p88_p12 = por %p86_p13, %p1113_p7  ;;  %s171_s6 = sand.u32 1, %s707_s11  }
  0x42   : > { %s433_s24 = sshll.u32 %s735_s18, 8  ;;  %p942_p10 = por %p92_p5, %p839_p6 }
  0x43   : > { %s420_s21 = sshll.u32 %s171_s6, 4  ;;  %s949_s25 = scalar_lea.hbm %s1087_s1, %s433_s24 }
  0x44   : > { %s1114_s20 = scalar_select %p942_p10, 1, 0 }
  0x45   : > { %p1115_p1 = scmp.lt.s32.totalorder %s739_s19, 8  ;;  %s175_s27 = scalar_lea.vmem [#allocation5], %s420_s21 }
  0x46   : > { %s184_s30 = sshll.u32 %s175_s27, 4  ;;  %s959_s2 = scalar_lea.sflag [#allocation6], %s171_s6  ;;  %s957_s30 = int_to_ptr.vmem [resolvable:$true] %s184_s30 }
  0x47   : > { %p953_p0 = pnand %p1115_p1, %p88_p12  ;;  %s583_s7 = scalar_lea.hbm %s949_s25, 256 }
  0x48   : > { %p584_p6 = scmp.ne.s32.totalorder %s949_s25, %s583_s7  ;;  %s588_s22 = scalar_lea.hbm %s1087_s1, 512 }
  0x49   : > { %p585_p3 = pneg %p953_p0  ;;  %p589_p9 = scmp.lt.u32.totalorder %s949_s25, %s1087_s1 }
  0x4a   : > { %p590_p13 = scmp.lt.u32.totalorder %s588_s22, %s583_s7  ;;  %p592_p7 = scmp.lt.u32.totalorder %s583_s7, %s949_s25 }
  0x4b   : > { %p586_p2 = pnand %p585_p3, %p584_p6 }
  0x4c   : > { %p591_p4 = por %p590_p13, %p589_p9 }
  0x4d   : > { %p587_p8 = pneg %p586_p2 }
  0x4e   : > { %p593_p12 = por %p592_p7, %p591_p4 }
  0x50   : > { %p594_p5 = pnand %p593_p12, %p587_p8 }
  0x52   : > { %597 = shalt.err (!%p594_p5)
}
  0x53   : > { %s598_s6 = scalar_lea.vmem %s957_s30, 256  ;;  %s744_s21 = smov [#allocation5]  }
  0x54   : > { %p599_p1 = scmp.ne.s32.totalorder %s957_s30, %s598_s6  ;;  %s603_s27 = sshll.u32 %s744_s21, 4  ;;  %s604_s27 = int_to_ptr.vmem [resolvable:$false] %s603_s27 }
  0x55   : > { %s605_s23 = scalar_lea.vmem %s604_s27, 512  ;;  %p606_p10 = scmp.lt.s32.totalorder %s957_s30, %s604_s27 }
  0x56   : > { %p601_p6 = pnand %p599_p1, %p585_p3  ;;  %p607_p9 = scmp.lt.s32.totalorder %s605_s23, %s598_s6 }
  0x58   : > { %p602_p2 = pneg %p601_p6  ;;  %p608_p13 = por %p607_p9, %p606_p10 }
  0x5a   : > { %p609_p4 = pnand %p608_p13, %p602_p2 }
  0x5c   : > { %612 = shalt.err (!%p609_p4)
}
  0x5d   : > { %s1117_s12 = smov 8   ;;  %s1118_s7 = smov 128  }
  0x5e   : > { %446 = dma.hbm_to_vmem [thread:$0]  (!%p953_p0), %s949_s25, 256, %s957_s30, %s959_s2, %s1118_s7, %s1118_s7, %s1117_s12  }
  0x5f   : > { %196 = sbr.rel (%p922_p11) target bundleno = 444 (0x1bc), region = 28  ;;  %s993_s24 = sand.u32 (!%p922_p11), 1, %s715_s13  }
  0x60   : > { %s424_s3 = sshll.u32 (!%p922_p11), %s993_s24, 4  ;;  %s199_s22 = scalar_lea.sflag (!%p922_p11), [#allocation3], %s993_s24 }
  0x61   : > { %s202_s9 = scalar_lea.vmem (!%p922_p11), [#allocation2], %s424_s3  ;;  %p1119_p10 = scmp.ne.s32.totalorder (!%p922_p11), %s1106_s28, 0 }
  0x66   : > { %686 = dma.done.wait (%p1119_p10), %s199_s22, 256  }
  0x67   : > { %688 = vsyncadd (%p1119_p10), %s199_s22, 4294967040  ;;  %s207_s26 = sand.u32 1, %s703_s10   ;;  %p1120_p11 = scmp.ne.s32.totalorder %s1114_s20, 0 }
  0x68   : > { %s425_s25 = sshll.u32 %s207_s26, 4  ;;  %s208_s30 = scalar_lea.sflag [#allocation6], %s207_s26 }
  0x69   : > { %s211_s2 = scalar_lea.vmem [#allocation5], %s425_s25 }
  0x6a   : > { %690 = dma.done.wait (%p1120_p11), %s208_s30, 256  }
  0x6b   : > { %692 = vsyncadd (%p1120_p11), %s208_s30, 4294967040  ;;  %v240_v0 = vld [vmem:[%s202_s9] sm:$0xff]  ;;  %vm246_vm0 = vcmask 130048   ;;  %v241_v2 = vld [vmem:[%s202_s9 + $0x8] sm:$0xff]  ;;  %s428_s28 = sshll.u32 %s723_s15, 1  ;;  %s429_s20 = sshll.u32 %s727_s16, 3 }
  0x6c   : > { %v242_v1 = vld [vmem:[%s211_s2] sm:$0xff]  ;;  %v243_v4 = vld [vmem:[%s211_s2 + $0x8] sm:$0xff]  ;;  %s286_s6 = sadd.s32 %s429_s20, %s428_s28  ;;  %s236_s27 = scalar_lea.vmem [#allocation7], %s424_s3 }
  0x6d   : > { %v244_v3 = vadd.f32 %v242_v1, %v240_v0  ;;  %v245_v5 = vadd.f32 %v243_v4, %v241_v2  ;;  %s430_s21 = sshll.u32 %s286_s6, 7  ;;  %s289_s23 = sshll.u32 %s236_s27, 4  ;;  %s1022_s23 = int_to_ptr.vmem [resolvable:$true] %s289_s23 }
  0x6e   : > { %s1121_s22 = sld [smem:[#allocation14_spill]]  ;;  %s272_s15 = scalar_lea.sflag [#allocation4], %s993_s24 }
  0x6f   : > { %v247_v6 = vsel %vm246_vm0, %v244_v3, -inf  ;;  %v250_v7 = vsel %vm246_vm0, %v245_v5, -inf  ;;  %s613_s16 = scalar_lea.vmem %s1022_s23, 256  ;;  %p1122_p3 = scmp.ne.s32.totalorder %s1107_s29, 0 }
  0x70   : > { %248 = vmax.xlane.f32.xlu0 %v247_v6  ;;  %p614_p0 = scmp.ne.s32.totalorder %s1022_s23, %s613_s16  ;;  %s745_s3 = smov [#allocation7]  }
  0x71   : > { %s617_s26 = sshll.u32 %s745_s3, 4  ;;  %s618_s26 = int_to_ptr.vmem [resolvable:$false] %s617_s26 }
  0x72   : > { %p615_p8 = pnand %p614_p0, %p1122_p3  ;;  %s619_s25 = scalar_lea.vmem %s618_s26, 512 }
  0x73   : > { %p620_p12 = scmp.lt.s32.totalorder %s1022_s23, %s618_s26  ;;  %p621_p5 = scmp.lt.s32.totalorder %s619_s25, %s613_s16 }
  0x74   : > { %251 = vmax.xlane.f32.xlu0 %v250_v7  ;;  %s1020_s9 = scalar_lea.hbm %s1121_s22, %s430_s21  ;;  %p616_p7 = pneg %p615_p8 }
  0x75   : > { %p622_p1 = por %p621_p5, %p620_p12 }
  0x77   : > { %p623_p6 = pnand %p622_p1, %p616_p7 }
  0xfd   : > { %v249_v8 = vpop.xlane.xlu0 %248 }
  0xfe   : > { %v253_v9 = vsub.f32 %v244_v3, %v249_v8 }
 0x100   : > { %v255_v10 = vmul.f32 1.442695, %v253_v9 }
 0x101   : > { %v252_v11 = vpop.xlane.xlu0 %251 }
 0x102   : > { %545 = vpow2.f32 %v255_v10  ;;  %v254_v12 = vsub.f32 %v245_v5, %v252_v11 }
 0x104   : > { %v257_v13 = vmul.f32 1.442695, %v254_v12 }
 0x106   : > { %547 = vpow2.f32 %v257_v13 }
 0x10c   : > { %v546_v14 = vpop.eup %545 }
 0x10d   : > { %v259_v15 = vsel %vm246_vm0, %v546_v14, 0.0 }
 0x10e   : > { %260 = vadd.xlane.f32.xlu1 %v259_v15 }
 0x110   : > { %v548_v16 = vpop.eup %547 }
 0x111   : > { %v262_v17 = vsel %vm246_vm0, %v548_v16, 0.0 }
 0x112   : > { %263 = vadd.xlane.f32.xlu1 %v262_v17 }
 0x19b   : > { %v261_v18 = vpop.xlane.xlu1 %260 }
 0x19c   : > { %549 = vrcp.f32 %v261_v18 }
 0x19f   : > { %v264_v19 = vpop.xlane.xlu1 %263 }
 0x1a0   : > { %551 = vrcp.f32 %v264_v19 }
 0x1a6   : > { %v550_v20 = vpop.eup %549 }
 0x1a7   : > { %v266_v21 = vmul.f32 %v550_v20, %v546_v14 }
 0x1a9   : > { %269 = vst.msk [vmem:[%s236_s27] sm:$0xff] %vm246_vm0, %v266_v21 }
 0x1aa   : > { %v552_v22 = vpop.eup %551 }
 0x1ab   : > { %v268_v23 = vmul.f32 %v552_v22, %v548_v16 }
 0x1ad   : > { %270 = vst.msk [vmem:[%s236_s27 + $0x8] sm:$0xff] %vm246_vm0, %v268_v23 }
 0x1ae   : > { %626 = shalt.err (!%p623_p6)
}
 0x1af   : > { %s627_s30 = scalar_lea.hbm %s1020_s9, 256  ;;  %s631_s20 = scalar_lea.hbm %s1121_s22, 2048 }
 0x1b0   : > { %p628_p2 = scmp.ne.s32.totalorder %s1020_s9, %s627_s30  ;;  %p632_p4 = scmp.lt.u32.totalorder %s1020_s9, %s1121_s22 }
 0x1b1   : > { %p633_p10 = scmp.lt.u32.totalorder %s631_s20, %s627_s30  ;;  %p635_p0 = scmp.lt.u32.totalorder %s627_s30, %s1020_s9 }
 0x1b2   : > { %p629_p9 = pnand %p628_p2, %p1122_p3 }
 0x1b3   : > { %p634_p11 = por %p633_p10, %p632_p4 }
 0x1b4   : > { %p630_p13 = pneg %p629_p9 }
 0x1b5   : > { %p636_p8 = por %p635_p0, %p634_p11 }
 0x1b7   : > { %p637_p7 = pnand %p636_p8, %p630_p13 }
 0x1b9   : > { %640 = shalt.err (!%p637_p7)
}
 0x1ba   : > { %s746_s27 = smov 128   ;;  %s747_s12 = smov 8  }
 0x1bb   : > { %438 = dma.vmem_to_hbm [thread:$0]  (%p1122_p3), %s1022_s23, 256, %s1020_s9, %s272_s15, %s746_s27, %s746_s27, %s747_s12  }
 0x1bc PF: > { %s1123_s7 = sld [smem:[#allocation11_spill]]  ;;  %p452_p12 = scmp.ge.s32.totalorder %s739_s19, 2 }
 0x1bd   : > { %p1124_p5 = scmp.ne.s32.totalorder %s1108_s4, 0 }
 0x1bf   : > { %p448_p1 = pnand %p452_p12, %p1124_p5 }
 0x1c2   : > { %s304_s16 = sand.u32 1, %s1123_s7  }
 0x1c3   : > { %s305_s3 = scalar_lea.sflag [#allocation4], %s304_s16 }
 0x1c4   : > { %694 = dma.done.wait (!%p448_p1), %s305_s3, 256  }
 0x1c5   : > { %696 = vsyncadd (!%p448_p1), %s305_s3, 4294967040  ;;  %s21_s19 = sadd.s32 1, %s739_s19   ;;  %s1125_s29 = sld [smem:[#allocation12_spill]] }
 0x1c6   : > { %p18_p6 = scmp.ge.s32.totalorder %s21_s19, 10   ;;  %s1126_s24 = sld [smem:[#allocation13_spill]] }
 0x1c7   : > { %s1127_s9 = smov %s703_s10  ;;  %s1128_s10 = smov %s707_s11 }
 0x1c8   : > { %s1129_s11 = smov %s932_s8  ;;  %s1130_s12 = smov %s715_s13 }
 0x1c9   : > { %s1131_s13 = smov %s719_s14  ;;  %s1132_s14 = smov %s867_s5 }
 0x1ca   : > { %s1133_s15 = smov %s731_s17  ;;  %s1134_s16 = smov %s735_s18 }
 0x1cb   : > { %s1135_s17 = smov %s1125_s29  ;;  %20 = sbr.rel (!%p18_p6) target bundleno = 13 (0xd), region = 86 }
 0x1cc   : > { %s1136_s18 = smov %s1126_s24 }
 0x1d2   :  { %310 = vsyncpa [#allocation3], 1 }
 0x1d3   :  { %312 = vsyncpa [#allocation3 + $0x1], 1 }
 0x1d4   :  { %313 = vsyncpa [#allocation6], 1 }
 0x1d5   :  { %315 = vsyncpa [#allocation6 + $0x1], 1 }
 0x1d6   :  { %316 = vsyncpa [#allocation4], 1 }
 0x1d7   :  { %318 = vsyncpa [#allocation4 + $0x1], 1 }

</bundles_post_ra>
